<compile_context>
chip_gen: v7x
topology: tpu7x:2x2x1
jax: 0.10.0
libtpu: 0.0.40
codegen_flags: <defaults>
</compile_context>

<pallas_src>
import jax
import jax.numpy as jnp
from jax import lax
from jax.experimental import pallas as pl
from jax.experimental.pallas import tpu as pltpu

NUM_METRICS = 46
DIM_IN = 16
DIM_PE = 8
DIM_EMB = 32
DIM_X = DIM_EMB - DIM_PE          # 24, expand_x projection width
HIDDEN = 2 * DIM_PE               # 16, MLP hidden (layers=2 branch)
K_CAT = DIM_IN + HIDDEN           # 32, stacked LHS width of the fused 2nd GEMM
BN_EPS = 1e-5
FUSED_MAX_N = 2048                # whole-batch fused path when feat fits easily in VMEM


# ---------------------------------------------------------------------------
# Fused single-pass kernel (small/medium N): BatchNorm batch stats + affine +
# MLP layer 1 + block-diagonal second GEMM + single full-width store.
# ---------------------------------------------------------------------------
def _fused_kernel(feat_ref, x_ref, gamma_ref, beta_ref,
                  w1_ref, wcat_ref, bias_ref, out_ref):
    feat = feat_ref[...].astype(jnp.float32)
    n = feat.shape[0]

    # BatchNorm1d(num_metrics), training-mode batch stats.
    # Centered variance (mean((x - mean)^2)) -> no catastrophic cancellation.
    mean = jnp.sum(feat, axis=0, keepdims=True) * (1.0 / n)
    centered = feat - mean
    var = jnp.sum(centered * centered, axis=0, keepdims=True) * (1.0 / n)
    scale = gamma_ref[...] * lax.rsqrt(var + BN_EPS)
    normed = centered * scale + beta_ref[...]

    b1 = bias_ref[:, :HIDDEN]
    bcat = bias_ref[:, HIDDEN:]

    # pe_encoder layer 1: Linear(46, 16) + ReLU
    h1 = jnp.maximum(
        jnp.dot(normed, w1_ref[...], preferred_element_type=jnp.float32) + b1, 0.0)

    # Fused second stage: [x | h1] @ [[Wx, 0], [0, W2]] + [bx | b2]
    #   columns [0, DIM_X)  -> linear_x(x)          (no ReLU)
    #   columns [DIM_X, ..) -> pe_encoder layer 2   (ReLU)
    lhs = jnp.concatenate([x_ref[...].astype(jnp.float32), h1], axis=1)
    pre = jnp.dot(lhs, wcat_ref[...], preferred_element_type=jnp.float32) + bcat
    col = lax.broadcasted_iota(jnp.int32, pre.shape, 1)
    out = jnp.where(col >= DIM_X, jnp.maximum(pre, 0.0), pre)
    out_ref[...] = out.astype(out_ref.dtype)   # one unmasked full-width store


# ---------------------------------------------------------------------------
# Two-pass path for large N.
# Pass 1: per-metric sum / sum-of-squares, accumulated over the node-tile axis,
#         with a "parallel" outer axis so both TensorCores help on v7x.
# ---------------------------------------------------------------------------
def _stats_kernel(feat_ref, sum_ref, sumsq_ref):
    @pl.when(pl.program_id(1) == 0)
    def _():
        sum_ref[...] = jnp.zeros_like(sum_ref)
        sumsq_ref[...] = jnp.zeros_like(sumsq_ref)

    f = feat_ref[...].astype(jnp.float32)
    sum_ref[...] += jnp.sum(f, axis=0).reshape(1, 1, NUM_METRICS)
    sumsq_ref[...] += jnp.sum(f * f, axis=0).reshape(1, 1, NUM_METRICS)


# ---------------------------------------------------------------------------
# Pass 2: BN already folded into W1/b1 in the wrapper; MLP layer 1 + fused
# block-diagonal second GEMM + single full-width store.
# ---------------------------------------------------------------------------
def _encoder_kernel(w1_ref, wcat_ref, bias_ref, feat_ref, x_ref, out_ref):
    b1 = bias_ref[:, :HIDDEN]
    bcat = bias_ref[:, HIDDEN:]

    h1 = jnp.maximum(
        jnp.dot(feat_ref[...].astype(jnp.float32), w1_ref[...],
                preferred_element_type=jnp.float32) + b1, 0.0)

    lhs = jnp.concatenate([x_ref[...].astype(jnp.float32), h1], axis=1)
    pre = jnp.dot(lhs, wcat_ref[...], preferred_element_type=jnp.float32) + bcat
    col = lax.broadcasted_iota(jnp.int32, pre.shape, 1)
    out = jnp.where(col >= DIM_X, jnp.maximum(pre, 0.0), pre)
    out_ref[...] = out.astype(out_ref.dtype)


# ---------------------------------------------------------------------------
# Wrapper helpers
# ---------------------------------------------------------------------------
def _make_wcat(params):
    """Block-diagonal (K_CAT, DIM_EMB) weight [[Wx, 0], [0, W2]]."""
    wcat = jnp.zeros((K_CAT, DIM_EMB), jnp.float32)
    wcat = wcat.at[:DIM_IN, :DIM_X].set(params["wx"])
    wcat = wcat.at[DIM_IN:, DIM_X:].set(params["w2"])
    return wcat


def _fused_forward(x, feat, params):
    N = x.shape[0]
    wcat = _make_wcat(params)
    bias = jnp.concatenate([params["b1"], params["bx"], params["b2"]], axis=1)
    return pl.pallas_call(
        _fused_kernel,
        out_shape=jax.ShapeDtypeStruct((N, DIM_EMB), jnp.float32),
    )(feat, x, params["gamma"], params["beta"], params["w1"], wcat, bias)


def _two_pass_forward(x, feat, params, tile_n):
    N = x.shape[0]
    assert N % tile_n == 0 and tile_n % 8 == 0, \
        "two-pass path requires N divisible by tile_n (multiple of 8)"
    # TODO(synk): add row-masked stats + padded tiles to lift the divisibility
    # requirement without biasing the batch mean/variance.
    n_tiles = N // tile_n
    P = 2 if n_tiles % 2 == 0 else 1     # split stats reduction across 2 TCs on v7x
    tiles_per_part = n_tiles // P

    s, ss = pl.pallas_call(
        _stats_kernel,
        out_shape=(jax.ShapeDtypeStruct((P, 1, NUM_METRICS), jnp.float32),
                   jax.ShapeDtypeStruct((P, 1, NUM_METRICS), jnp.float32)),
        grid_spec=pltpu.PrefetchScalarGridSpec(
            num_scalar_prefetch=0,
            grid=(P, tiles_per_part),
            in_specs=[pl.BlockSpec((tile_n, NUM_METRICS),
                                   lambda p, i: (p * tiles_per_part + i, 0))],
            out_specs=[pl.BlockSpec((1, 1, NUM_METRICS), lambda p, i: (p, 0, 0)),
                       pl.BlockSpec((1, 1, NUM_METRICS), lambda p, i: (p, 0, 0))],
        ),
        compiler_params=pltpu.CompilerParams(
            dimension_semantics=("parallel", "arbitrary")),
    )(feat)

    total = jnp.sum(s, axis=0)            # (1, NUM_METRICS)
    total_sq = jnp.sum(ss, axis=0)        # (1, NUM_METRICS)
    mean = total / N
    var = jnp.maximum(total_sq / N - mean * mean, 0.0)   # biased variance
    # TODO(synk): E[x^2]-E[x]^2 loses precision for metrics with |mean| >> std.

    # Fold BatchNorm affine into the first MLP layer (one-time JAX work).
    scale = params["gamma"] * lax.rsqrt(var + BN_EPS)              # (1, 46)
    w1f = params["w1"] * scale.reshape(NUM_METRICS, 1)             # (46, 16)
    b1f = params["b1"] + (params["beta"] - mean * scale) @ params["w1"]  # (1, 16)

    wcat = _make_wcat(params)
    bias = jnp.concatenate([b1f, params["bx"], params["b2"]], axis=1)

    full = lambda shape: pl.BlockSpec(shape, lambda i: (0, 0))
    out = pl.pallas_call(
        _encoder_kernel,
        out_shape=jax.ShapeDtypeStruct((N, DIM_EMB), jnp.float32),
        grid_spec=pltpu.PrefetchScalarGridSpec(
            num_scalar_prefetch=0,
            grid=(n_tiles,),
            in_specs=[
                full((NUM_METRICS, HIDDEN)),                           # W1 (BN-folded)
                full((K_CAT, DIM_EMB)),                                # [[Wx,0],[0,W2]]
                full((1, HIDDEN + DIM_EMB)),                           # packed biases
                pl.BlockSpec((tile_n, NUM_METRICS), lambda i: (i, 0)), # feat
                pl.BlockSpec((tile_n, DIM_IN), lambda i: (i, 0)),      # x
            ],
            out_specs=pl.BlockSpec((tile_n, DIM_EMB), lambda i: (i, 0)),
        ),
        compiler_params=pltpu.CompilerParams(
            dimension_semantics=("parallel",)),
    )(w1f, wcat, bias, feat, x)
    return out


def network_science_node_encoder(x, feat, params, *, tile_n=1024):
    """Returns (batch.x, pe_<kernel_type>) — pass_as_var=True semantics."""
    N = x.shape[0]
    if N <= FUSED_MAX_N:
        out = _fused_forward(x, feat, params)
    else:
        t = min(tile_n, N)
        while N % t != 0 and t > 8:
            t //= 2
        out = _two_pass_forward(x, feat, params, t)
    pe = out[:, DIM_X:]   # cheap slice; no duplicated HBM write in the kernel
    return out, pe


# ---------------------------------------------------------------------------
# Pure-JAX reference + params
# ---------------------------------------------------------------------------
def _reference(x, feat, params):
    mean = jnp.mean(feat, axis=0, keepdims=True)
    var = jnp.mean((feat - mean) ** 2, axis=0, keepdims=True)
    normed = (feat - mean) * lax.rsqrt(var + BN_EPS) * params["gamma"] + params["beta"]
    h1 = jnp.maximum(normed @ params["w1"] + params["b1"], 0.0)
    pe = jnp.maximum(h1 @ params["w2"] + params["b2"], 0.0)
    h = x @ params["wx"] + params["bx"]
    return jnp.concatenate([h, pe], axis=1), pe


def _init_params(key):
    ks = jax.random.split(key, 8)
    scale = 0.1
    return {
        "gamma": jnp.ones((1, NUM_METRICS), jnp.float32)
                 + 0.01 * jax.random.normal(ks[0], (1, NUM_METRICS), jnp.float32),
        "beta": 0.01 * jax.random.normal(ks[1], (1, NUM_METRICS), jnp.float32),
        "w1": scale * jax.random.normal(ks[2], (NUM_METRICS, HIDDEN), jnp.float32),
        "b1": scale * jax.random.normal(ks[3], (1, HIDDEN), jnp.float32),
        "w2": scale * jax.random.normal(ks[4], (HIDDEN, DIM_PE), jnp.float32),
        "b2": scale * jax.random.normal(ks[5], (1, DIM_PE), jnp.float32),
        "wx": scale * jax.random.normal(ks[6], (DIM_IN, DIM_X), jnp.float32),
        "bx": scale * jax.random.normal(ks[7], (1, DIM_X), jnp.float32),
    }


if __name__ == "__main__":
    key = jax.random.PRNGKey(0)
    kp, kx, kf = jax.random.split(key, 3)
    params = _init_params(kp)

    # --- small batch: fused single-pass kernel ---
    N_small = 128
    x_s = jax.random.normal(kx, (N_small, DIM_IN), jnp.float32)            # batch.x
    f_s = jax.random.normal(kf, (N_small, NUM_METRICS), jnp.float32)       # batch.Netsci_feature
    out_s, pe_s = network_science_node_encoder(x_s, f_s, params)
    out_s = jax.block_until_ready(out_s)
    pe_s = jax.block_until_ready(pe_s)
    ref_out_s, ref_pe_s = _reference(x_s, f_s, params)
    assert out_s.shape == (N_small, DIM_EMB) and pe_s.shape == (N_small, DIM_PE)
    assert jnp.allclose(out_s, ref_out_s, atol=1e-5, rtol=1e-5)
    assert jnp.allclose(pe_s, ref_pe_s, atol=1e-5, rtol=1e-5)

    # --- larger batch: two-pass tiled path (stats + BN-folded encoder) ---
    N_large = 4096
    kx2, kf2 = jax.random.split(jax.random.PRNGKey(1))
    x_l = jax.random.normal(kx2, (N_large, DIM_IN), jnp.float32)
    f_l = jax.random.normal(kf2, (N_large, NUM_METRICS), jnp.float32)
    out_l, pe_l = network_science_node_encoder(x_l, f_l, params)
    out_l = jax.block_until_ready(out_l)
    pe_l = jax.block_until_ready(pe_l)
    ref_out_l, ref_pe_l = _reference(x_l, f_l, params)
    assert out_l.shape == (N_large, DIM_EMB) and pe_l.shape == (N_large, DIM_PE)
    assert jnp.allclose(out_l, ref_out_l, atol=2e-3, rtol=2e-3)
    assert jnp.allclose(pe_l, ref_pe_l, atol=2e-3, rtol=2e-3)

    print("KERNEL_OK")
</pallas_src>

<mosaic_0001>
module attributes {stable_mosaic.version = 11 : i64} {
  func.func @_fused_kernel(%arg0: memref<128x46xf32, #tpu.memory_space<vmem>>, %arg1: memref<128x16xf32, #tpu.memory_space<vmem>>, %arg2: memref<1x46xf32, #tpu.memory_space<vmem>>, %arg3: memref<1x46xf32, #tpu.memory_space<vmem>>, %arg4: memref<46x16xf32, #tpu.memory_space<vmem>>, %arg5: memref<32x32xf32, #tpu.memory_space<vmem>>, %arg6: memref<1x48xf32, #tpu.memory_space<vmem>>, %arg7: memref<128x32xf32, #tpu.memory_space<vmem>>) attributes {dimension_semantics = [], scalar_prefetch = 0 : i64, scratch_operands = 0 : i64, tpu.core_type = #tpu.core_type<tc>} {
    %c0 = arith.constant 0 : index
    %c0_0 = arith.constant 0 : index
    %0 = vector.load %arg0[%c0, %c0_0] : memref<128x46xf32, #tpu.memory_space<vmem>>, vector<128x46xf32>
    %cst = arith.constant dense<0.000000e+00> : vector<46xf32>
    %1 = vector.multi_reduction <add>, %0, %cst [0] : vector<128x46xf32> to vector<46xf32>
    %2 = vector.shape_cast %1 : vector<46xf32> to vector<1x46xf32>
    %cst_1 = arith.constant 7.812500e-03 : f32
    %3 = vector.broadcast %cst_1 : f32 to vector<1x46xf32>
    %4 = arith.mulf %2, %3 : vector<1x46xf32>
    %5 = vector.broadcast %4 : vector<1x46xf32> to vector<128x46xf32>
    %6 = arith.subf %0, %5 : vector<128x46xf32>
    %7 = arith.mulf %6, %6 : vector<128x46xf32>
    %cst_2 = arith.constant dense<0.000000e+00> : vector<46xf32>
    %8 = vector.multi_reduction <add>, %7, %cst_2 [0] : vector<128x46xf32> to vector<46xf32>
    %9 = vector.shape_cast %8 : vector<46xf32> to vector<1x46xf32>
    %cst_3 = arith.constant 7.812500e-03 : f32
    %10 = vector.broadcast %cst_3 : f32 to vector<1x46xf32>
    %11 = arith.mulf %9, %10 : vector<1x46xf32>
    %c0_4 = arith.constant 0 : index
    %c0_5 = arith.constant 0 : index
    %12 = vector.load %arg2[%c0_4, %c0_5] : memref<1x46xf32, #tpu.memory_space<vmem>>, vector<1x46xf32>
    %cst_6 = arith.constant 9.99999974E-6 : f32
    %13 = vector.broadcast %cst_6 : f32 to vector<1x46xf32>
    %14 = arith.addf %11, %13 : vector<1x46xf32>
    %15 = math.rsqrt %14 : vector<1x46xf32>
    %16 = arith.mulf %12, %15 : vector<1x46xf32>
    %17 = vector.broadcast %16 : vector<1x46xf32> to vector<128x46xf32>
    %18 = arith.mulf %6, %17 : vector<128x46xf32>
    %c0_7 = arith.constant 0 : index
    %c0_8 = arith.constant 0 : index
    %19 = vector.load %arg3[%c0_7, %c0_8] : memref<1x46xf32, #tpu.memory_space<vmem>>, vector<1x46xf32>
    %20 = vector.broadcast %19 : vector<1x46xf32> to vector<128x46xf32>
    %21 = arith.addf %18, %20 : vector<128x46xf32>
    %c0_9 = arith.constant 0 : index
    %c0_10 = arith.constant 0 : index
    %22 = vector.load %arg6[%c0_9, %c0_10] : memref<1x48xf32, #tpu.memory_space<vmem>>, vector<1x16xf32>
    %c0_11 = arith.constant 0 : index
    %c16 = arith.constant 16 : index
    %23 = vector.load %arg6[%c0_11, %c16] : memref<1x48xf32, #tpu.memory_space<vmem>>, vector<1x32xf32>
    %c0_12 = arith.constant 0 : index
    %c0_13 = arith.constant 0 : index
    %24 = vector.load %arg4[%c0_12, %c0_13] : memref<46x16xf32, #tpu.memory_space<vmem>>, vector<46x16xf32>
    %cst_14 = arith.constant dense<0.000000e+00> : vector<128x16xf32>
    %25 = tpu.matmul %21, %24, %cst_14 {dimension_numbers = #tpu.dot_dimension_numbers<[1], [0], [0], [1], [0, 0, 1, 1], [], []>} : vector<128x46xf32>, vector<46x16xf32>, vector<128x16xf32> -> vector<128x16xf32>
    %26 = vector.broadcast %22 : vector<1x16xf32> to vector<128x16xf32>
    %27 = arith.addf %25, %26 : vector<128x16xf32>
    %cst_15 = arith.constant 0.000000e+00 : f32
    %28 = vector.broadcast %cst_15 : f32 to vector<128x16xf32>
    %29 = arith.maximumf %27, %28 : vector<128x16xf32>
    %c0_16 = arith.constant 0 : index
    %c0_17 = arith.constant 0 : index
    %30 = vector.load %arg1[%c0_16, %c0_17] : memref<128x16xf32, #tpu.memory_space<vmem>>, vector<128x16xf32>
    %31 = tpu.concatenate %30, %29 in 1 : vector<128x16xf32>, vector<128x16xf32> -> vector<128x32xf32>
    %c0_18 = arith.constant 0 : index
    %c0_19 = arith.constant 0 : index
    %32 = vector.load %arg5[%c0_18, %c0_19] : memref<32x32xf32, #tpu.memory_space<vmem>>, vector<32x32xf32>
    %cst_20 = arith.constant dense<0.000000e+00> : vector<128x32xf32>
    %33 = tpu.matmul %31, %32, %cst_20 {dimension_numbers = #tpu.dot_dimension_numbers<[1], [0], [0], [1], [0, 0, 1, 1], [], []>} : vector<128x32xf32>, vector<32x32xf32>, vector<128x32xf32> -> vector<128x32xf32>
    %34 = vector.broadcast %23 : vector<1x32xf32> to vector<128x32xf32>
    %35 = arith.addf %33, %34 : vector<128x32xf32>
    %36 = tpu.iota {dimensions = array<i32: 1>} : vector<128x32xi32>
    %c24_i32 = arith.constant 24 : i32
    %37 = vector.broadcast %c24_i32 : i32 to vector<128x32xi32>
    %38 = arith.cmpi sge, %36, %37 : vector<128x32xi32>
    %cst_21 = arith.constant 0.000000e+00 : f32
    %39 = vector.broadcast %cst_21 : f32 to vector<128x32xf32>
    %40 = arith.maximumf %35, %39 : vector<128x32xf32>
    %41 = arith.select %38, %40, %35 : vector<128x32xi1>, vector<128x32xf32>
    %c0_22 = arith.constant 0 : index
    %c0_23 = arith.constant 0 : index
    %42 = vector.load %arg7[%c0_22, %c0_23] : memref<128x32xf32, #tpu.memory_space<vmem>>, vector<128x32xf32>
    tpu.vector_store %arg7[%c0_22, %c0_23], %41 {strides = array<i32>} : memref<128x32xf32, #tpu.memory_space<vmem>>, vector<128x32xf32>,
    return
  }
}

</mosaic_0001>

<bundles_post_ra>
// kernel: tpu_custom_call.1
= control target key start
LH: loop header
LB: loop body
LE: loop exit
PB: predicated region body
PF: predicated region fallthrough
CT: control target
= control target key end

     0   :  { %vm42_vm0 = vcmask 375808   ;;  %vm261_vm1 = vcmask 1045504   ;;  %vm951_vm2 = vmmov 1   ;;  %vm506_vm4 = vcmask 130048   ;;  %s1451_s4 = inlined_call_operand.vmem [shape: f32[46,16], index: 4, kind: input, shape index: {}]   ;;  %s1452_s0 = inlined_call_operand.vmem [shape: f32[128,46], index: 0, kind: input, shape index: {}]   ;;  %s1453_s2 = inlined_call_operand.vmem [shape: f32[1,46], index: 2, kind: input, shape index: {}]   ;;  %s1454_s3 = inlined_call_operand.vmem [shape: f32[1,46], index: 3, kind: input, shape index: {}]   ;;  %s1455_s5 = inlined_call_operand.vmem [shape: f32[32,32], index: 5, kind: input, shape index: {}]   ;;  %s1456_s6 = inlined_call_operand.vmem [shape: f32[1,48], index: 6, kind: input, shape index: {}]   ;;  %s1457_s1 = inlined_call_operand.vmem [shape: f32[128,16], index: 1, kind: input, shape index: {}]   ;;  %s1458_s7 = inlined_call_operand.vmem [shape: f32[128,32], index: 7, kind: output, shape index: {}]  }
   0x1   :  { %v201_v0 = vld [vmem:[%s1451_s4] sm:$0xff]  ;;  %v202_v1 = vld [vmem:[%s1451_s4 + $0x8] sm:$0xff]  ;;  %v203_v2 = vld [vmem:[%s1451_s4 + $0x10] sm:$0xff]  ;;  %vm530_vm5 = vcmask 261120  }
   0x2   :  { %v924_v3 = vpack.c.bf16 %v202_v1, %v201_v0  ;;  %v204_v4 = vld [vmem:[%s1451_s4 + $0x18] sm:$0xff]  ;;  %v205_v5 = vld [vmem:[%s1451_s4 + $0x20] sm:$0xff]  ;;  %v206_v7 = vld [vmem:[%s1451_s4 + $0x28] sm:$0x3f] }
   0x3   :  { %v928_v6 = vpack.c.bf16 %v204_v4, %v203_v2  ;;  %v1015_v8 = vld [vmem:[%s1452_s0] sm:$0xff]  ;;  %v1020_v9 = vld [vmem:[%s1452_s0 + $0x8] sm:$0xff]  ;;  %v28_v10 = vld [vmem:[%s1452_s0 + $0x10] sm:$0xff]  ;;  %v932_v17 = vpack.c.bf16 %v206_v7, %v205_v5 }
   0x4   :  { %925 = vmatprep.subr.bf16.mxu0 %v924_v3  ;;  %v29_v11 = vld [vmem:[%s1452_s0 + $0x18] sm:$0xff]  ;;  %v43_v12 = vsel %vm42_vm0, %v1015_v8, 0.0  ;;  %v44_v13 = vsel %vm42_vm0, %v1020_v9, 0.0  ;;  %v30_v14 = vld [vmem:[%s1452_s0 + $0x20] sm:$0xff]  ;;  %v46_v16 = vsel %vm42_vm0, %v28_v10, 0.0  ;;  %vm933_vm3 = vmpackc.low %vm261_vm1, %vm951_vm2 }
   0x5   :  { %927 = vmatpush3.bf16.msra.mxu0 %v924_v3  ;;  %v45_v15 = vadd.f32 %v44_v13, %v43_v12  ;;  %v48_v18 = vsel %vm42_vm0, %v29_v11, 0.0  ;;  %v31_v19 = vld [vmem:[%s1452_s0 + $0x28] sm:$0xff]  ;;  %v50_v21 = vsel %vm42_vm0, %v30_v14, 0.0  ;;  %v32_v22 = vld [vmem:[%s1452_s0 + $0x30] sm:$0xff]  ;;  %v33_v25 = vld [vmem:[%s1452_s0 + $0x38] sm:$0xff] }
   0x6   :  { %929 = vmatprep.subr.bf16.mxu0 %v928_v6  ;;  %v52_v24 = vsel %vm42_vm0, %v31_v19, 0.0  ;;  %v54_v27 = vsel %vm42_vm0, %v32_v22, 0.0  ;;  %v34_v28 = vld [vmem:[%s1452_s0 + $0x40] sm:$0xff]  ;;  %v56_v30 = vsel %vm42_vm0, %v33_v25, 0.0  ;;  %v35_v31 = vld [vmem:[%s1452_s0 + $0x48] sm:$0xff]  ;;  %v36_v34 = vld [vmem:[%s1452_s0 + $0x50] sm:$0xff] }
   0x7   :  { %v47_v20 = vadd.f32 %v46_v16, %v45_v15  ;;  %v58_v33 = vsel %vm42_vm0, %v34_v28, 0.0  ;;  %v60_v36 = vsel %vm42_vm0, %v35_v31, 0.0  ;;  %v37_v37 = vld [vmem:[%s1452_s0 + $0x58] sm:$0xff]  ;;  %v62_v39 = vsel %vm42_vm0, %v36_v34, 0.0  ;;  %v38_v40 = vld [vmem:[%s1452_s0 + $0x60] sm:$0xff]  ;;  %v39_v43 = vld [vmem:[%s1452_s0 + $0x68] sm:$0xff] }
   0x8   :  { %v64_v42 = vsel %vm42_vm0, %v37_v37, 0.0  ;;  %v66_v45 = vsel %vm42_vm0, %v38_v40, 0.0  ;;  %v40_v46 = vld [vmem:[%s1452_s0 + $0x70] sm:$0xff]  ;;  %v68_v48 = vsel %vm42_vm0, %v39_v43, 0.0  ;;  %v41_v49 = vld [vmem:[%s1452_s0 + $0x78] sm:$0xff] }
   0x9   :  { %931 = vmatpush3.bf16.msra.mxu0 %v928_v6  ;;  %v49_v23 = vadd.f32 %v48_v18, %v47_v20  ;;  %v70_v51 = vsel %vm42_vm0, %v40_v46, 0.0  ;;  %v72_v53 = vsel %vm42_vm0, %v41_v49, 0.0 }
   0xa   :  { %934 = vmatprep.subr.msk.bf16.mxu0 %vm933_vm3, %v932_v17 }
   0xb   :  { %v51_v26 = vadd.f32 %v50_v21, %v49_v23 }
   0xd   :  { %937 = vmatpush3.bf16.msk.msra.mxu0 %vm933_vm3, %v932_v17  ;;  %v53_v29 = vadd.f32 %v52_v24, %v51_v26 }
   0xf   :  { %v55_v32 = vadd.f32 %v54_v27, %v53_v29 }
  0x11   :  { %v57_v35 = vadd.f32 %v56_v30, %v55_v32 }
  0x13   :  { %v59_v38 = vadd.f32 %v58_v33, %v57_v35 }
  0x15   :  { %v61_v41 = vadd.f32 %v60_v36, %v59_v38 }
  0x17   :  { %v63_v44 = vadd.f32 %v62_v39, %v61_v41 }
  0x19   :  { %v65_v47 = vadd.f32 %v64_v42, %v63_v44 }
  0x1b   :  { %v67_v50 = vadd.f32 %v66_v45, %v65_v47 }
  0x1d   :  { %v69_v52 = vadd.f32 %v68_v48, %v67_v50 }
  0x1f   :  { %v71_v54 = vadd.f32 %v70_v51, %v69_v52 }
  0x21   :  { %v73_v55 = vadd.f32 %v72_v53, %v71_v54 }
  0x23   :  { %v74_v56 = vrot.slane %v73_v55, 4 }
  0x25   :  { %v75_v57 = vadd.f32 %v74_v56, %v73_v55 }
  0x27   :  { %v76_v58 = vrot.slane %v75_v57, 2 }
  0x29   :  { %v77_v59 = vadd.f32 %v76_v58, %v75_v57 }
  0x2b   :  { %v78_v60 = vrot.slane %v77_v59, 1 }
  0x2d   :  { %v79_v61 = vadd.f32 %v78_v60, %v77_v59 }
  0x2f   :  { %v80_v62 = vmul.f32 0.0078125, %v79_v61 }
  0x31   :  { %v1083_v63 = vsub.f32 %v1015_v8, %v80_v62  ;;  %v1086_v0 = vsub.f32 %v1020_v9, %v80_v62  ;;  %v1088_v1 = vsub.f32 %v28_v10, %v80_v62  ;;  %v1090_v2 = vsub.f32 %v29_v11, %v80_v62 }
  0x32   :  { %v1092_v3 = vsub.f32 %v30_v14, %v80_v62  ;;  %v1100_v7 = vsub.f32 %v31_v19, %v80_v62  ;;  %v1104_v9 = vsub.f32 %v32_v22, %v80_v62  ;;  %v1111_v15 = vsub.f32 %v33_v25, %v80_v62 }
  0x33   :  { %v97_v4 = vmul.f32 %v1083_v63, %v1083_v63  ;;  %v98_v5 = vmul.f32 %v1086_v0, %v1086_v0  ;;  %v99_v6 = vmul.f32 %v1088_v1, %v1088_v1  ;;  %v100_v8 = vmul.f32 %v1090_v2, %v1090_v2 }
  0x34   :  { %v101_v10 = vmul.f32 %v1092_v3, %v1092_v3  ;;  %v102_v16 = vmul.f32 %v1100_v7, %v1100_v7  ;;  %v1116_v19 = vsub.f32 %v34_v28, %v80_v62  ;;  %v103_v20 = vmul.f32 %v1104_v9, %v1104_v9 }
  0x35   :  { %v113_v11 = vsel %vm42_vm0, %v97_v4, 0.0  ;;  %v114_v12 = vsel %vm42_vm0, %v98_v5, 0.0  ;;  %v116_v13 = vsel %vm42_vm0, %v99_v6, 0.0  ;;  %v118_v17 = vsel %vm42_vm0, %v100_v8, 0.0 }
  0x36   :  { %v115_v14 = vadd.f32 %v114_v12, %v113_v11  ;;  %v120_v21 = vsel %vm42_vm0, %v101_v10, 0.0  ;;  %v1121_v23 = vsub.f32 %v35_v31, %v80_v62  ;;  %v104_v24 = vmul.f32 %v1111_v15, %v1111_v15 }
  0x37   :  { %v122_v25 = vsel %vm42_vm0, %v102_v16, 0.0  ;;  %v1126_v27 = vsub.f32 %v36_v34, %v80_v62  ;;  %v105_v28 = vmul.f32 %v1116_v19, %v1116_v19  ;;  %v124_v29 = vsel %vm42_vm0, %v103_v20, 0.0  ;;  %v151_v16 = vld [vmem:[%s1453_s2] sm:$0x1] }
  0x38   :  { %v117_v18 = vadd.f32 %v116_v13, %v115_v14  ;;  %v1131_v32 = vsub.f32 %v37_v37, %v80_v62  ;;  %v106_v31 = vmul.f32 %v1121_v23, %v1121_v23  ;;  %v126_v33 = vsel %vm42_vm0, %v104_v24, 0.0 }
  0x39   :  { %v1136_v36 = vsub.f32 %v38_v40, %v80_v62  ;;  %v107_v34 = vmul.f32 %v1126_v27, %v1126_v27  ;;  %v128_v38 = vsel %vm42_vm0, %v105_v28, 0.0  ;;  %v1141_v41 = vsub.f32 %v39_v43, %v80_v62 }
  0x3a   :  { %v119_v22 = vadd.f32 %v118_v17, %v117_v18  ;;  %v108_v37 = vmul.f32 %v1131_v32, %v1131_v32  ;;  %v130_v42 = vsel %vm42_vm0, %v106_v31, 0.0  ;;  %v1146_v45 = vsub.f32 %v40_v46, %v80_v62 }
  0x3b   :  { %v109_v40 = vmul.f32 %v1136_v36, %v1136_v36  ;;  %v132_v47 = vsel %vm42_vm0, %v107_v34, 0.0  ;;  %v1151_v50 = vsub.f32 %v41_v49, %v80_v62  ;;  %v110_v43 = vmul.f32 %v1141_v41, %v1141_v41 }
  0x3c   :  { %v121_v26 = vadd.f32 %v120_v21, %v119_v22  ;;  %v134_v51 = vsel %vm42_vm0, %v108_v37, 0.0  ;;  %v111_v53 = vmul.f32 %v1146_v45, %v1146_v45  ;;  %v156_v13 = vlaneseq  ;;  %v779_v22 = vld [vmem:[%s1454_s3] ss:$0 sm:$0xff] }
  0x3d   :  { %v136_v46 = vsel %vm42_vm0, %v109_v40, 0.0  ;;  %v112_v55 = vmul.f32 %v1151_v50, %v1151_v50  ;;  %v138_v56 = vsel %vm42_vm0, %v110_v43, 0.0 }
  0x3e   :  { %v123_v30 = vadd.f32 %v122_v25, %v121_v26  ;;  %v140_v49 = vsel %vm42_vm0, %v111_v53, 0.0  ;;  %v157_v14 = vshrl.u32 %v156_v13, 7 }
  0x3f   :  { %v142_v59 = vsel %vm42_vm0, %v112_v55, 0.0 }
  0x40   :  { %v125_v35 = vadd.f32 %v124_v29, %v123_v30  ;;  %v158_v17 = vsub.s32 0, %v157_v14 }
  0x42   :  { %v127_v39 = vadd.f32 %v126_v33, %v125_v35 }
  0x44   :  { %v129_v44 = vadd.f32 %v128_v38, %v127_v39 }
  0x46   :  { %v131_v48 = vadd.f32 %v130_v42, %v129_v44 }
  0x48   :  { %v133_v52 = vadd.f32 %v132_v47, %v131_v48 }
  0x4a   :  { %v135_v54 = vadd.f32 %v134_v51, %v133_v52  ;;  %v526_v52 = vld [vmem:[%s1455_s5 + $0x18] sm:$0xff] }
  0x4c   :  { %v137_v57 = vadd.f32 %v136_v46, %v135_v54  ;;  %v1218_v46 = vld [vmem:[%s1456_s6] ss:$0 sm:$0xff]  ;;  %s953_s6 = smov 112  }
  0x4e   :  { %v139_v58 = vadd.f32 %v138_v56, %v137_v57 }
  0x50   :  { %v141_v60 = vadd.f32 %v140_v49, %v139_v58 }
  0x52   :  { %v143_v61 = vadd.f32 %v142_v59, %v141_v60 }
  0x54   :  { %v144_v62 = vrot.slane %v143_v61, 4 }
  0x56   :  { %v145_v4 = vadd.f32 %v144_v62, %v143_v61 }
  0x58   :  { %v146_v5 = vrot.slane %v145_v4, 2 }
  0x5a   :  { %v147_v6 = vadd.f32 %v146_v5, %v145_v4 }
  0x5c   :  { %v148_v8 = vrot.slane %v147_v6, 1 }
  0x5e   :  { %v149_v10 = vadd.f32 %v148_v8, %v147_v6 }
  0x60   :  { %v150_v11 = vmul.f32 0.0078125, %v149_v10 }
  0x62   :  { %v152_v12 = vadd.f32 1e-05, %v150_v11 }
  0x64   :  { %949 = vrsqrt.f32 %v152_v12 }
  0x6e   :  { %v950_v18 = vpop.eup %949 }
  0x6f   :  { %v154_v20 = vmul.f32 %v950_v18, %v151_v16 }
  0x71   :  { %v159_v21 = vrot.slane %v154_v20, %v158_v17 }
  0x73   :  { %v161_v24 = vmul.f32 %v159_v21, %v1083_v63  ;;  %v162_v25 = vmul.f32 %v159_v21, %v1086_v0  ;;  %v163_v26 = vmul.f32 %v159_v21, %v1088_v1  ;;  %v164_v28 = vmul.f32 %v159_v21, %v1090_v2 }
  0x74   :  { %v165_v33 = vmul.f32 %v159_v21, %v1092_v3  ;;  %v166_v34 = vmul.f32 %v159_v21, %v1100_v7  ;;  %v167_v0 = vmul.f32 %v159_v21, %v1104_v9  ;;  %v168_v2 = vmul.f32 %v159_v21, %v1111_v15 }
  0x75   :  { %v184_v29 = vadd.f32 %v779_v22, %v161_v24  ;;  %v185_v30 = vadd.f32 %v779_v22, %v162_v25  ;;  %v186_v31 = vadd.f32 %v779_v22, %v163_v26  ;;  %v187_v35 = vadd.f32 %v779_v22, %v164_v28 }
  0x76   :  { %v188_v63 = vadd.f32 %v779_v22, %v165_v33  ;;  %v189_v1 = vadd.f32 %v779_v22, %v166_v34  ;;  %v190_v3 = vadd.f32 %v779_v22, %v167_v0  ;;  %v169_v38 = vmul.f32 %v159_v21, %v1116_v19 }
  0x77   :  { %868 = vmatprep.mubr.msk.f32.mxu0 %vm42_vm0, %v184_v29  ;;  %v191_v39 = vadd.f32 %v779_v22, %v168_v2  ;;  %v170_v7 = vmul.f32 %v159_v21, %v1121_v23  ;;  %v171_v9 = vmul.f32 %v159_v21, %v1126_v27  ;;  %v172_v15 = vmul.f32 %v159_v21, %v1131_v32 }
  0x78   :  { %869 = vmatmul.mubr.msk.f32.vlgmr.msra.gmra.mrb[0].mxu0 %vm42_vm0, %v185_v30  ;;  %v192_v37 = vadd.f32 %v779_v22, %v169_v38  ;;  %v173_v19 = vmul.f32 %v159_v21, %v1136_v36  ;;  %v174_v23 = vmul.f32 %v159_v21, %v1141_v41  ;;  %v175_v27 = vmul.f32 %v159_v21, %v1146_v45  ;;  %v523_v41 = vld [vmem:[%s1455_s5] sm:$0xff]  ;;  %v524_v45 = vld [vmem:[%s1455_s5 + $0x8] sm:$0xff] }
  0x79   :  { %871 = vmatprep.mubr.msk.f32.mxu0 %vm42_vm0, %v186_v31  ;;  %v193_v42 = vadd.f32 %v779_v22, %v170_v7  ;;  %v194_v44 = vadd.f32 %v779_v22, %v171_v9  ;;  %v195_v40 = vadd.f32 %v779_v22, %v172_v15  ;;  %v176_v32 = vmul.f32 %v159_v21, %v1151_v50  ;;  %v525_v50 = vld [vmem:[%s1455_s5 + $0x10] sm:$0xff]  ;;  %s952_s5 = smov 16  }
  0x7a   :  { %v196_v47 = vadd.f32 %v779_v22, %v173_v19  ;;  %v197_v48 = vadd.f32 %v779_v22, %v174_v23  ;;  %v198_v43 = vadd.f32 %v779_v22, %v175_v27  ;;  %v938_v51 = vpack.c.bf16 %v524_v45, %v523_v41  ;;  %v428_v27 = vld [vmem:[%s1457_s1 + $0x10] sm:$0xff]  ;;  %v429_v45 = vld [vmem:[%s1457_s1 + $0x18] sm:$0xff] }
  0x7b   :  { %v199_v36 = vadd.f32 %v779_v22, %v176_v32  ;;  %v942_v53 = vpack.c.bf16 %v526_v52, %v525_v50 }
  0x7c   :  { %872 = vmatmul.mubr.msk.f32.gmra.mrb[2].mxu0 %vm42_vm0, %v187_v35  ;;  %939 = vmatprep.subr.bf16.mxu1 %v938_v51 }
  0x7d   :  { %874 = vmatprep.mubr.msk.f32.mxu0 %vm42_vm0, %v188_v63  ;;  %941 = vmatpush3.bf16.msra.mxu1 %v938_v51  ;;  %v430_v51 = vld [vmem:[%s1457_s1 + $0x20] sm:$0xff] }
  0x7e   :  { %943 = vmatprep.subr.bf16.mxu1 %v942_v53 }
  0x80   :  { %875 = vmatmul.mubr.msk.f32.gmra.mrb[4].mxu0 %vm42_vm0, %v189_v1 }
  0x81   :  { %877 = vmatprep.mubr.msk.f32.mxu0 %vm42_vm0, %v190_v3  ;;  %945 = vmatpush3.bf16.msra.mxu1 %v942_v53 }
  0x84   :  { %878 = vmatmul.mubr.msk.f32.gmra.mrb[6].mxu0 %vm42_vm0, %v191_v39 }
  0x85   :  { %880 = vmatprep.mubr.msk.f32.mxu0 %vm42_vm0, %v192_v37 }
  0x88   :  { %881 = vmatmul.mubr.msk.f32.gmra.mrb[8].mxu0 %vm42_vm0, %v193_v42 }
  0x89   :  { %883 = vmatprep.mubr.msk.f32.mxu0 %vm42_vm0, %v194_v44 }
  0x8c   :  { %884 = vmatmul.mubr.msk.f32.gmra.mrb[10].mxu0 %vm42_vm0, %v195_v40  ;;  %v426_v40 = vld [vmem:[%s1457_s1] sm:$0xff] }
  0x8d   :  { %886 = vmatprep.mubr.msk.f32.mxu0 %vm42_vm0, %v196_v47 }
  0x90   :  { %887 = vmatmul.mubr.msk.f32.gmra.mrb[12].mxu0 %vm42_vm0, %v197_v48  ;;  %v427_v48 = vld [vmem:[%s1457_s1 + $0x8] sm:$0xff] }
  0x91   :  { %889 = vmatprep.mubr.msk.f32.mxu0 %vm42_vm0, %v198_v43 }
  0x94   :  { %890 = vmatmul.mubr.msk.f32.gmra.mrb[14].mxu0 %vm42_vm0, %v199_v36 }
 0x14b   :  { %v870_v54 = vpop.f32.mrb[0].mxu0 }
 0x14c   :  { %v331_v55 = vpop.f32.mrb[1].mxu0  ;;  %v337_v57 = vadd.f32 %v870_v54, %v1218_v46  ;;  %v431_v54 = vld [vmem:[%s1457_s1 + $0x28] sm:$0xff] }
 0x14d   :  { %v332_v56 = vadd.f32 %v1218_v46, %v331_v55  ;;  %v432_v55 = vld [vmem:[%s1457_s1 + $0x30] sm:$0xff] }
 0x14e   :  { %v411_v61 = vmax.f32 %v337_v57, 0.0 }
 0x14f   :  { %v410_v49 = vmax.f32 %v332_v56, 0.0  ;;  %v873_v58 = vpop.f32.mrb[2].mxu0 }
 0x150   :  { %v341_v59 = vpop.f32.mrb[3].mxu0  ;;  %v347_v62 = vadd.f32 %v873_v58, %v1218_v46 }
 0x151   :  { %v342_v60 = vadd.f32 %v1218_v46, %v341_v59  ;;  %458 = vrot.lane.b32.xlu0 %v410_v49, %s952_s5  ;;  %v433_v59 = vld [vmem:[%s1457_s1 + $0x38] sm:$0xff] }
 0x152   :  { %v413_v10 = vmax.f32 %v347_v62, 0.0 }
 0x153   :  { %v412_v4 = vmax.f32 %v342_v60, 0.0  ;;  %v876_v5 = vpop.f32.mrb[4].mxu0  ;;  %v434_v60 = vld [vmem:[%s1457_s1 + $0x40] sm:$0xff] }
 0x154   :  { %v351_v6 = vpop.f32.mrb[5].mxu0  ;;  %v357_v11 = vadd.f32 %v876_v5, %v1218_v46 }
 0x155   :  { %462 = vrot.lane.b32.xlu1 %v412_v4, %s952_s5  ;;  %460 = vrot.lane.b32.xlu0 %v411_v61, %s952_s5  ;;  %v352_v8 = vadd.f32 %v1218_v46, %v351_v6  ;;  %v435_v6 = vld [vmem:[%s1457_s1 + $0x48] sm:$0xff] }
 0x156   :  { %v415_v18 = vmax.f32 %v357_v11, 0.0 }
 0x157   :  { %v414_v12 = vmax.f32 %v352_v8, 0.0  ;;  %v879_v14 = vpop.f32.mrb[6].mxu0  ;;  %v436_v8 = vld [vmem:[%s1457_s1 + $0x50] sm:$0xff] }
 0x158   :  { %v361_v16 = vpop.f32.mrb[7].mxu0  ;;  %v367_v20 = vadd.f32 %v879_v14, %v1218_v46 }
 0x159   :  { %464 = vrot.lane.b32.xlu1 %v413_v10, %s952_s5  ;;  %v362_v17 = vadd.f32 %v1218_v46, %v361_v16  ;;  %466 = vrot.lane.b32.xlu0 %v414_v12, %s952_s5  ;;  %v437_v16 = vld [vmem:[%s1457_s1 + $0x58] sm:$0xff] }
 0x15a   :  { %v417_v26 = vmax.f32 %v367_v20, 0.0 }
 0x15b   :  { %v416_v21 = vmax.f32 %v362_v17, 0.0  ;;  %v882_v22 = vpop.f32.mrb[8].mxu0  ;;  %v438_v17 = vld [vmem:[%s1457_s1 + $0x60] sm:$0xff] }
 0x15c   :  { %v371_v24 = vpop.f32.mrb[9].mxu0  ;;  %v377_v28 = vadd.f32 %v882_v22, %v1218_v46 }
 0x15d   :  { %468 = vrot.lane.b32.xlu1 %v415_v18, %s952_s5  ;;  %v372_v25 = vadd.f32 %v1218_v46, %v371_v24  ;;  %470 = vrot.lane.b32.xlu0 %v416_v21, %s952_s5  ;;  %v439_v24 = vld [vmem:[%s1457_s1 + $0x68] sm:$0xff] }
 0x15e   :  { %v419_v35 = vmax.f32 %v377_v28, 0.0 }
 0x15f   :  { %v418_v29 = vmax.f32 %v372_v25, 0.0  ;;  %v885_v30 = vpop.f32.mrb[10].mxu0  ;;  %v440_v25 = vld [vmem:[%s1457_s1 + $0x70] sm:$0xff] }
 0x160   :  { %v381_v31 = vpop.f32.mrb[11].mxu0  ;;  %v387_v34 = vadd.f32 %v885_v30, %v1218_v46 }
 0x161   :  { %472 = vrot.lane.b32.xlu1 %v417_v26, %s952_s5  ;;  %v382_v33 = vadd.f32 %v1218_v46, %v381_v31  ;;  %474 = vrot.lane.b32.xlu0 %v418_v29, %s952_s5  ;;  %v441_v31 = vld [vmem:[%s1457_s1 + $0x78] sm:$0xff] }
 0x162   :  { %v421_v3 = vmax.f32 %v387_v34, 0.0  ;;  %v1334_v34 = vand.u32 127, %v156_v13 }
 0x163   :  { %v420_v63 = vmax.f32 %v382_v33, 0.0  ;;  %v888_v0 = vpop.f32.mrb[12].mxu0 }
 0x164   :  { %v391_v1 = vpop.f32.mrb[13].mxu0  ;;  %v397_v38 = vadd.f32 %v888_v0, %v1218_v46  ;;  %vm726_vm6 = vcmp.ge.s32.totalorder %v1334_v34, 24 }
 0x165   :  { %476 = vrot.lane.b32.xlu1 %v419_v35, %s952_s5  ;;  %v392_v2 = vadd.f32 %v1218_v46, %v391_v1  ;;  %478 = vrot.lane.b32.xlu0 %v420_v63, %s952_s5 }
 0x166   :  { %v423_v42 = vmax.f32 %v397_v38, 0.0 }
 0x167   :  { %v422_v39 = vmax.f32 %v392_v2, 0.0  ;;  %v891_v7 = vpop.f32.mrb[14].mxu0 }
 0x168   :  { %v401_v37 = vpop.f32.mrb[15].mxu0  ;;  %v407_v15 = vadd.f32 %v891_v7, %v1218_v46 }
 0x169   :  { %480 = vrot.lane.b32.xlu1 %v421_v3, %s952_s5  ;;  %v402_v9 = vadd.f32 %v1218_v46, %v401_v37  ;;  %482 = vrot.lane.b32.xlu0 %v422_v39, %s952_s5 }
 0x16a   :  { %v425_v19 = vmax.f32 %v407_v15, 0.0 }
 0x16b   :  { %v424_v44 = vmax.f32 %v402_v9, 0.0 }
 0x16d   :  { %484 = vrot.lane.b32.xlu1 %v423_v42, %s952_s5  ;;  %486 = vrot.lane.b32.xlu0 %v424_v44, %s952_s5 }
 0x171   :  { %488 = vrot.lane.b32.xlu1 %v425_v19, %s952_s5  ;;  %527 = vrot.lane.b32.xlu0 %v1218_v46, %s953_s6 }
 0x1c3   :  { %v459_v23 = vpop.permute.xlu0 %458 }
 0x1c4   :  { %v507_v47 = vsel %vm506_vm4, %v426_v40, %v459_v23 }
 0x1c5   :  { %900 = vmatprep.mubr.msk.f32.mxu1 %vm530_vm5, %v507_v47 }
 0x1c7   :  { %v463_v32 = vpop.permute.xlu1 %462  ;;  %v461_v43 = vpop.permute.xlu0 %460 }
 0x1c8   :  { %v509_v36 = vsel %vm506_vm4, %v428_v27, %v463_v32  ;;  %v508_v41 = vsel %vm506_vm4, %v427_v48, %v461_v43 }
 0x1c9   :  { %901 = vmatmul.mubr.msk.f32.vlgmr.msra.gmra.mrb[0].mxu1 %vm530_vm5, %v508_v41 }
 0x1ca   :  { %903 = vmatprep.mubr.msk.f32.mxu1 %vm530_vm5, %v509_v36 }
 0x1cb   :  { %v465_v50 = vpop.permute.xlu1 %464  ;;  %v467_v52 = vpop.permute.xlu0 %466 }
 0x1cc   :  { %v510_v53 = vsel %vm506_vm4, %v429_v45, %v465_v50  ;;  %v511_v46 = vsel %vm506_vm4, %v430_v51, %v467_v52 }
 0x1cd   :  { %904 = vmatmul.mubr.msk.f32.gmra.mrb[2].mxu1 %vm530_vm5, %v510_v53 }
 0x1ce   :  { %906 = vmatprep.mubr.msk.f32.mxu1 %vm530_vm5, %v511_v46 }
 0x1cf   :  { %v469_v56 = vpop.permute.xlu1 %468  ;;  %v471_v57 = vpop.permute.xlu0 %470 }
 0x1d0   :  { %v512_v49 = vsel %vm506_vm4, %v431_v54, %v469_v56  ;;  %v513_v58 = vsel %vm506_vm4, %v432_v55, %v471_v57 }
 0x1d1   :  { %907 = vmatmul.mubr.msk.f32.gmra.mrb[4].mxu1 %vm530_vm5, %v512_v49 }
 0x1d2   :  { %909 = vmatprep.mubr.msk.f32.mxu1 %vm530_vm5, %v513_v58 }
 0x1d3   :  { %v473_v61 = vpop.permute.xlu1 %472  ;;  %v475_v62 = vpop.permute.xlu0 %474 }
 0x1d4   :  { %v514_v4 = vsel %vm506_vm4, %v433_v59, %v473_v61  ;;  %v515_v5 = vsel %vm506_vm4, %v434_v60, %v475_v62 }
 0x1d5   :  { %910 = vmatmul.mubr.msk.f32.gmra.mrb[6].mxu1 %vm530_vm5, %v514_v4 }
 0x1d6   :  { %912 = vmatprep.mubr.msk.f32.mxu1 %vm530_vm5, %v515_v5 }
 0x1d7   :  { %v477_v10 = vpop.permute.xlu1 %476  ;;  %v479_v11 = vpop.permute.xlu0 %478 }
 0x1d8   :  { %v516_v12 = vsel %vm506_vm4, %v435_v6, %v477_v10  ;;  %v517_v14 = vsel %vm506_vm4, %v436_v8, %v479_v11 }
 0x1d9   :  { %913 = vmatmul.mubr.msk.f32.gmra.mrb[8].mxu1 %vm530_vm5, %v516_v12 }
 0x1da   :  { %915 = vmatprep.mubr.msk.f32.mxu1 %vm530_vm5, %v517_v14 }
 0x1db   :  { %v481_v18 = vpop.permute.xlu1 %480  ;;  %v483_v20 = vpop.permute.xlu0 %482 }
 0x1dc   :  { %v518_v21 = vsel %vm506_vm4, %v437_v16, %v481_v18  ;;  %v519_v22 = vsel %vm506_vm4, %v438_v17, %v483_v20 }
 0x1dd   :  { %916 = vmatmul.mubr.msk.f32.gmra.mrb[10].mxu1 %vm530_vm5, %v518_v21 }
 0x1de   :  { %918 = vmatprep.mubr.msk.f32.mxu1 %vm530_vm5, %v519_v22 }
 0x1df   :  { %v485_v26 = vpop.permute.xlu1 %484  ;;  %v487_v28 = vpop.permute.xlu0 %486 }
 0x1e0   :  { %v520_v29 = vsel %vm506_vm4, %v439_v24, %v485_v26  ;;  %v521_v30 = vsel %vm506_vm4, %v440_v25, %v487_v28 }
 0x1e1   :  { %919 = vmatmul.mubr.msk.f32.gmra.mrb[12].mxu1 %vm530_vm5, %v520_v29 }
 0x1e2   :  { %921 = vmatprep.mubr.msk.f32.mxu1 %vm530_vm5, %v521_v30 }
 0x1e3   :  { %v489_v33 = vpop.permute.xlu1 %488  ;;  %v1336_v63 = vpop.permute.xlu0 %527 }
 0x1e4   :  { %v522_v35 = vsel %vm506_vm4, %v441_v31, %v489_v33 }
 0x1e5   :  { %922 = vmatmul.mubr.msk.f32.gmra.mrb[14].mxu1 %vm530_vm5, %v522_v35 }
 0x29c   :  { %v902_v0 = vpop.f32.mrb[0].mxu1 }
 0x29d   :  { %v651_v1 = vadd.f32 %v902_v0, %v1336_v63  ;;  %v645_v2 = vpop.f32.mrb[1].mxu1 }
 0x29e   :  { %v646_v3 = vadd.f32 %v645_v2, %v1336_v63 }
 0x29f   :  { %v728_v38 = vmax.f32 %v651_v1, 0.0 }
 0x2a0   :  { %v727_v39 = vmax.f32 %v646_v3, 0.0  ;;  %v905_v7 = vpop.f32.mrb[2].mxu1 }
 0x2a1   :  { %v744_v37 = vsel %vm726_vm6, %v728_v38, %v651_v1  ;;  %v661_v9 = vadd.f32 %v905_v7, %v1336_v63  ;;  %v655_v13 = vpop.f32.mrb[3].mxu1 }
 0x2a2   :  { %760 = vst.msk [vmem:[%s1458_s7 + $0x8] sm:$0xff] %vm530_vm5, %v744_v37  ;;  %v743_v42 = vsel %vm726_vm6, %v727_v39, %v646_v3  ;;  %v656_v15 = vadd.f32 %v655_v13, %v1336_v63 }
 0x2a3   :  { %759 = vst.msk [vmem:[%s1458_s7] sm:$0xff] %vm530_vm5, %v743_v42  ;;  %v730_v44 = vmax.f32 %v661_v9, 0.0 }
 0x2a4   :  { %v729_v19 = vmax.f32 %v656_v15, 0.0  ;;  %v908_v40 = vpop.f32.mrb[4].mxu1 }
 0x2a5   :  { %v746_v23 = vsel %vm726_vm6, %v730_v44, %v661_v9  ;;  %v671_v47 = vadd.f32 %v908_v40, %v1336_v63  ;;  %v665_v27 = vpop.f32.mrb[5].mxu1 }
 0x2a6   :  { %762 = vst.msk [vmem:[%s1458_s7 + $0x18] sm:$0xff] %vm530_vm5, %v746_v23  ;;  %v745_v48 = vsel %vm726_vm6, %v729_v19, %v656_v15  ;;  %v666_v32 = vadd.f32 %v665_v27, %v1336_v63 }
 0x2a7   :  { %761 = vst.msk [vmem:[%s1458_s7 + $0x10] sm:$0xff] %vm530_vm5, %v745_v48  ;;  %v732_v43 = vmax.f32 %v671_v47, 0.0 }
 0x2a8   :  { %v731_v36 = vmax.f32 %v666_v32, 0.0  ;;  %v911_v41 = vpop.f32.mrb[6].mxu1 }
 0x2a9   :  { %v748_v45 = vsel %vm726_vm6, %v732_v43, %v671_v47  ;;  %v681_v51 = vadd.f32 %v911_v41, %v1336_v63  ;;  %v675_v50 = vpop.f32.mrb[7].mxu1 }
 0x2aa   :  { %764 = vst.msk [vmem:[%s1458_s7 + $0x28] sm:$0xff] %vm530_vm5, %v748_v45  ;;  %v747_v52 = vsel %vm726_vm6, %v731_v36, %v666_v32  ;;  %v676_v53 = vadd.f32 %v675_v50, %v1336_v63 }
 0x2ab   :  { %763 = vst.msk [vmem:[%s1458_s7 + $0x20] sm:$0xff] %vm530_vm5, %v747_v52  ;;  %v734_v46 = vmax.f32 %v681_v51, 0.0 }
 0x2ac   :  { %v733_v54 = vmax.f32 %v676_v53, 0.0  ;;  %v914_v55 = vpop.f32.mrb[8].mxu1 }
 0x2ad   :  { %v750_v56 = vsel %vm726_vm6, %v734_v46, %v681_v51  ;;  %v691_v57 = vadd.f32 %v914_v55, %v1336_v63  ;;  %v685_v49 = vpop.f32.mrb[9].mxu1 }
 0x2ae   :  { %766 = vst.msk [vmem:[%s1458_s7 + $0x38] sm:$0xff] %vm530_vm5, %v750_v56  ;;  %v749_v58 = vsel %vm726_vm6, %v733_v54, %v676_v53  ;;  %v686_v59 = vadd.f32 %v685_v49, %v1336_v63 }
 0x2af   :  { %765 = vst.msk [vmem:[%s1458_s7 + $0x30] sm:$0xff] %vm530_vm5, %v749_v58  ;;  %v736_v60 = vmax.f32 %v691_v57, 0.0 }
 0x2b0   :  { %v735_v61 = vmax.f32 %v686_v59, 0.0  ;;  %v917_v62 = vpop.f32.mrb[10].mxu1 }
 0x2b1   :  { %v752_v4 = vsel %vm726_vm6, %v736_v60, %v691_v57  ;;  %v701_v5 = vadd.f32 %v917_v62, %v1336_v63  ;;  %v695_v6 = vpop.f32.mrb[11].mxu1 }
 0x2b2   :  { %768 = vst.msk [vmem:[%s1458_s7 + $0x48] sm:$0xff] %vm530_vm5, %v752_v4  ;;  %v751_v8 = vsel %vm726_vm6, %v735_v61, %v686_v59  ;;  %v696_v10 = vadd.f32 %v695_v6, %v1336_v63 }
 0x2b3   :  { %767 = vst.msk [vmem:[%s1458_s7 + $0x40] sm:$0xff] %vm530_vm5, %v751_v8  ;;  %v738_v11 = vmax.f32 %v701_v5, 0.0 }
 0x2b4   :  { %v737_v12 = vmax.f32 %v696_v10, 0.0  ;;  %v920_v14 = vpop.f32.mrb[12].mxu1 }
 0x2b5   :  { %v754_v16 = vsel %vm726_vm6, %v738_v11, %v701_v5  ;;  %v711_v17 = vadd.f32 %v920_v14, %v1336_v63  ;;  %v705_v18 = vpop.f32.mrb[13].mxu1 }
 0x2b6   :  { %770 = vst.msk [vmem:[%s1458_s7 + $0x58] sm:$0xff] %vm530_vm5, %v754_v16  ;;  %v753_v20 = vsel %vm726_vm6, %v737_v12, %v696_v10  ;;  %v706_v21 = vadd.f32 %v705_v18, %v1336_v63 }
 0x2b7   :  { %769 = vst.msk [vmem:[%s1458_s7 + $0x50] sm:$0xff] %vm530_vm5, %v753_v20  ;;  %v740_v22 = vmax.f32 %v711_v17, 0.0 }
 0x2b8   :  { %v739_v24 = vmax.f32 %v706_v21, 0.0  ;;  %v923_v25 = vpop.f32.mrb[14].mxu1 }
 0x2b9   :  { %v756_v26 = vsel %vm726_vm6, %v740_v22, %v711_v17  ;;  %v721_v28 = vadd.f32 %v923_v25, %v1336_v63  ;;  %v715_v29 = vpop.f32.mrb[15].mxu1 }
 0x2ba   :  { %772 = vst.msk [vmem:[%s1458_s7 + $0x68] sm:$0xff] %vm530_vm5, %v756_v26  ;;  %v755_v30 = vsel %vm726_vm6, %v739_v24, %v706_v21  ;;  %v716_v31 = vadd.f32 %v715_v29, %v1336_v63 }
 0x2bb   :  { %771 = vst.msk [vmem:[%s1458_s7 + $0x60] sm:$0xff] %vm530_vm5, %v755_v30  ;;  %v742_v33 = vmax.f32 %v721_v28, 0.0 }
 0x2bc   :  { %v741_v35 = vmax.f32 %v716_v31, 0.0 }
 0x2bd   :  { %v758_v0 = vsel %vm726_vm6, %v742_v33, %v721_v28 }
 0x2be   :  { %774 = vst.msk [vmem:[%s1458_s7 + $0x78] sm:$0xff] %vm530_vm5, %v758_v0  ;;  %v757_v1 = vsel %vm726_vm6, %v741_v35, %v716_v31 }
 0x2bf   :  { %773 = vst.msk [vmem:[%s1458_s7 + $0x70] sm:$0xff] %vm530_vm5, %v757_v1 }

</bundles_post_ra>
